<compile_context>
chip_gen: v5e
topology: v5e:2x2
jax: 0.10.0
libtpu: 0.0.40
codegen_flags: <defaults>
</compile_context>

<pallas_src>
import functools
import math

import jax
import jax.numpy as jnp
from jax.experimental import pallas as pl
from jax.experimental.pallas import tpu as pltpu

_LN_EPS = 1e-5
_BN_EPS = 1e-5
_LANES = 128          # lane width; also the padded output / slab width
_WROW_ALIGN = 16      # bf16 sublane tile -> align each packed weight's row offset


def get_same_pad(k, s, d):
    assert not (s > 1 and d > 1)
    if s > 1:
        return (k - s + 1) // 2
    return (k - 1) * d // 2


def _round_up(x, m):
    return (x + m - 1) // m * m


# --------------------------------------------------------------------------
# Fused Pallas kernel: ResBlocks -> MHA -> LN -> Linear -> LN (one batch row/step)
# --------------------------------------------------------------------------
def _stream_kernel(x_ref, w_ref, v_ref, out_ref, *, blocks, attn):
    (E, H, Dh, NH, NHP, _T, qkv_off, wo_off, ff_off, avrow) = attn

    h = x_ref[0]                                           # (L0, C0) f32

    # ---------------- conv ResBlocks (all in VMEM/vregs, no HBM round trips) ---
    for (K, dil, pad, stride, cin, cout, lin, lout,
         w_off, s_off, pool_off, vrow) in blocks:
        xb = h.astype(jnp.bfloat16)                        # (lin, cin) matmul operand
        if pad > 0:                                        # in-kernel halo (no jnp.pad in HBM)
            z = jnp.zeros((pad, cin), jnp.float32)
            xpb = jnp.concatenate([z, h, z], axis=0).astype(jnp.bfloat16)
        else:
            xpb = xb

        # Dilated conv = K accumulated small MXU dots over sublane-shifted slices
        # (no im2col concat, no K-times activation copy).
        acc = jnp.dot(xpb[0:lin, :], w_ref[w_off:w_off + cin, :cout],
                      preferred_element_type=jnp.float32)
        for k in range(1, K):
            acc = acc + jnp.dot(
                xpb[k * dil:k * dil + lin, :],
                w_ref[w_off + k * cin:w_off + (k + 1) * cin, :cout],
                preferred_element_type=jnp.float32)

        # BatchNorm(eval) + conv bias folded into one FMA; ReLU; Dropout = identity.
        hh = jnp.maximum(acc * v_ref[vrow:vrow + 1, :cout]
                         + v_ref[vrow + 1:vrow + 2, :cout], 0.0)

        # 1x1 "scale" conv residual on the un-padded input.
        hh = (hh + jnp.dot(xb, w_ref[s_off:s_off + cin, :cout],
                           preferred_element_type=jnp.float32)
              + v_ref[vrow + 2:vrow + 3, :cout])

        if stride > 1:
            # AvgPool1d(stride) as a precomputed bf16 (lout, lin) pooling matmul.
            hh = jnp.dot(w_ref[pool_off:pool_off + lout, :lin],
                         hh.astype(jnp.bfloat16),
                         preferred_element_type=jnp.float32)
        h = hh                                             # (lout, cout) f32

    # ---------------- self-attention (fused QKV; 1/sqrt(Dh) folded into q cols) ---
    xb = h.astype(jnp.bfloat16)                            # (T, E)
    qkv = (jnp.dot(xb, w_ref[qkv_off:qkv_off + E, :3 * E],
                   preferred_element_type=jnp.float32)
           + v_ref[avrow:avrow + 1, :3 * E])
    qkv = qkv.astype(jnp.bfloat16)

    attn_out = None
    for hd in range(H):                                    # static head loop, no concats
        q = qkv[:, hd * Dh:(hd + 1) * Dh]
        kk = qkv[:, E + hd * Dh:E + (hd + 1) * Dh]
        vv = qkv[:, 2 * E + hd * Dh:2 * E + (hd + 1) * Dh]
        s = jax.lax.dot_general(q, kk, (((1,), (1,)), ((), ())),
                                preferred_element_type=jnp.float32)   # (T, T)
        s = s - jnp.max(s, axis=-1, keepdims=True)
        p = jnp.exp(s)
        p = p * pl.reciprocal(jnp.sum(p, axis=-1, keepdims=True), approx=True)
        o = jnp.dot(p.astype(jnp.bfloat16), vv,
                    preferred_element_type=jnp.float32)               # (T, Dh)
        # Head-merge folded into per-head slices of the output projection weight.
        proj = jnp.dot(o.astype(jnp.bfloat16),
                       w_ref[wo_off + hd * Dh:wo_off + (hd + 1) * Dh, :E],
                       preferred_element_type=jnp.float32)
        attn_out = proj if attn_out is None else attn_out + proj
    attn_out = attn_out + v_ref[avrow + 1:avrow + 2, :E]              # out-proj bias

    # ---------------- LayerNorm(E) -> Linear -> LayerNorm(NH), stats in f32 -------
    mu = jnp.mean(attn_out, axis=-1, keepdims=True)
    var = jnp.mean(jnp.square(attn_out - mu), axis=-1, keepdims=True)
    h1 = ((attn_out - mu) * jax.lax.rsqrt(var + _LN_EPS)
          * v_ref[avrow + 2:avrow + 3, :E] + v_ref[avrow + 3:avrow + 4, :E])

    # FF into a lane-dense 128-wide slab; columns >= NH are exactly zero because the
    # packed wff / bff rows are zero there.  LayerNorm2 stats masked to real columns.
    y = (jnp.dot(h1.astype(jnp.bfloat16), w_ref[ff_off:ff_off + E, :NHP],
                 preferred_element_type=jnp.float32)
         + v_ref[avrow + 4:avrow + 5, :NHP])
    lane = jax.lax.broadcasted_iota(jnp.int32, (1, NHP), 1)
    mask = (lane < NH).astype(jnp.float32)
    inv_nh = 1.0 / NH
    mu2 = jnp.sum(y, axis=-1, keepdims=True) * inv_nh
    d = (y - mu2) * mask
    var2 = jnp.sum(d * d, axis=-1, keepdims=True) * inv_nh
    out = (d * jax.lax.rsqrt(var2 + _LN_EPS) * v_ref[avrow + 5:avrow + 6, :NHP]
           + v_ref[avrow + 6:avrow + 7, :NHP])

    out_ref[...] = out[None].astype(out_ref.dtype)         # (1, T, 128) unmasked store


# --------------------------------------------------------------------------
# Wrapper: one pallas_call, grid over batch only
# --------------------------------------------------------------------------
@functools.partial(jax.jit, static_argnames=('meta',))
def stream_block_forward(x_ncl, wslab, vslab, *, meta):
    L0, C0, blocks_meta, attn_meta, (wrows, vrows) = meta
    (E, H, Dh, NH, NHP, T, qkv_off, wo_off, ff_off, avrow) = attn_meta
    B = x_ncl.shape[0]
    x_blc = jnp.transpose(x_ncl, (0, 2, 1))                # NCL -> (B, L, C)

    kern = functools.partial(_stream_kernel, blocks=blocks_meta, attn=attn_meta)
    out = pl.pallas_call(
        kern,
        grid=(B,),
        out_shape=jax.ShapeDtypeStruct((B, T, NHP), jnp.float32),
        in_specs=[
            pl.BlockSpec((1, L0, C0), lambda b: (b, 0, 0)),        # one batch row / step
            pl.BlockSpec((wrows, _LANES), lambda b: (0, 0)),       # packed bf16 weight slab
            pl.BlockSpec((vrows, _LANES), lambda b: (0, 0)),       # packed f32 vector slab
        ],
        out_specs=pl.BlockSpec((1, T, NHP), lambda b: (b, 0, 0)),  # lane-dense (T, 128)
        compiler_params=pltpu.CompilerParams(
            dimension_semantics=("parallel",),                     # both TCs on v7x
            vmem_limit_bytes=32 * 1024 * 1024),
    )(x_blc, wslab, vslab)
    return out[..., :NH]                                   # strip lane padding outside


# --------------------------------------------------------------------------
# Deterministic parameter init (PyTorch layouts)
# --------------------------------------------------------------------------
def init_params(key, in_channel, out_channels, kernels, n_heads, n_hidden):
    keys = iter(jax.random.split(key, 64))
    nxt = lambda: next(keys)

    blocks = []
    in_c = in_channel
    for i, out_c in enumerate(out_channels):
        K = kernels[i]
        blocks.append(dict(
            conv_w=0.1 * jax.random.normal(nxt(), (out_c, in_c, K), jnp.float32),
            conv_b=0.1 * jax.random.normal(nxt(), (out_c,), jnp.float32),
            bn_gamma=1.0 + 0.1 * jax.random.normal(nxt(), (out_c,), jnp.float32),
            bn_beta=0.1 * jax.random.normal(nxt(), (out_c,), jnp.float32),
            bn_mean=0.1 * jax.random.normal(nxt(), (out_c,), jnp.float32),
            bn_var=jax.random.uniform(nxt(), (out_c,), jnp.float32, 0.5, 1.5),
            scale_w=0.1 * jax.random.normal(nxt(), (out_c, in_c, 1), jnp.float32),
            scale_b=0.1 * jax.random.normal(nxt(), (out_c,), jnp.float32),
        ))
        in_c = out_c

    E = out_channels[-1]
    attn = dict(
        in_proj_w=0.1 * jax.random.normal(nxt(), (3 * E, E), jnp.float32),
        in_proj_b=0.1 * jax.random.normal(nxt(), (3 * E,), jnp.float32),
        out_proj_w=0.1 * jax.random.normal(nxt(), (E, E), jnp.float32),
        out_proj_b=0.1 * jax.random.normal(nxt(), (E,), jnp.float32),
    )
    head = dict(
        g1=1.0 + 0.1 * jax.random.normal(nxt(), (E,), jnp.float32),
        b1=0.1 * jax.random.normal(nxt(), (E,), jnp.float32),
        ff_w=0.1 * jax.random.normal(nxt(), (n_hidden, E), jnp.float32),
        ff_b=0.1 * jax.random.normal(nxt(), (n_hidden,), jnp.float32),
        g2=1.0 + 0.1 * jax.random.normal(nxt(), (n_hidden,), jnp.float32),
        b2=0.1 * jax.random.normal(nxt(), (n_hidden,), jnp.float32),
    )
    return dict(blocks=blocks, attn=attn, head=head)


# --------------------------------------------------------------------------
# Constant folding + packing into two slabs (bf16 matmul operands / f32 vectors)
# --------------------------------------------------------------------------
def prepare_params(raw, kernels, strides, dilation, n_heads, n_hidden, in_len):
    mats, mat_offs = [], []
    next_row = [0]

    def add_mat(m):                       # bf16 matmul operand; 16-row aligned offset
        assert m.shape[1] <= _LANES
        off = next_row[0]
        mats.append(m)
        mat_offs.append(off)
        next_row[0] = _round_up(off + m.shape[0], _WROW_ALIGN)
        return off

    vecs = []
    def add_vec(v):                       # one f32 row per per-channel vector
        assert v.shape[0] <= _LANES
        vecs.append(v)
        return len(vecs) - 1

    blocks_meta = []
    lin = in_len
    C0 = raw['blocks'][0]['conv_w'].shape[1]
    for i, bp in enumerate(raw['blocks']):
        conv_w = bp['conv_w']                              # (Cout, Cin, K)
        cout, cin, K = conv_w.shape
        stride = strides[i]
        pad = get_same_pad(K, 1, dilation)
        assert lin + 2 * pad - dilation * (K - 1) == lin   # 'same' conv length
        w_off = add_mat(jnp.transpose(conv_w, (2, 1, 0)).reshape(K * cin, cout))
        s_off = add_mat(jnp.transpose(bp['scale_w'][:, :, 0], (1, 0)))     # (Cin, Cout)
        lout = lin // stride if stride > 1 else lin
        pool_off = -1
        if stride > 1:                    # hoisted AvgPool matrix, already scaled by 1/stride
            assert lin <= _LANES
            rows = jnp.arange(lout)[:, None]
            cols = jnp.arange(lin)[None, :]
            pool = jnp.where((cols >= rows * stride) & (cols < (rows + 1) * stride),
                             1.0 / stride, 0.0).astype(jnp.float32)
            pool_off = add_mat(pool)
        bn_scale = bp['bn_gamma'] / jnp.sqrt(bp['bn_var'] + _BN_EPS)       # eval-mode BN fold
        b_eff = bp['conv_b'] * bn_scale + (bp['bn_beta'] - bp['bn_mean'] * bn_scale)
        vrow = add_vec(bn_scale)
        add_vec(b_eff)
        add_vec(bp['scale_b'])
        blocks_meta.append((K, dilation, pad, stride, cin, cout, lin, lout,
                            w_off, s_off, pool_off, vrow))
        lin = lout

    ap, hd = raw['attn'], raw['head']
    E = ap['out_proj_w'].shape[0]
    assert E % n_heads == 0
    Dh = E // n_heads
    assert 3 * E <= _LANES and n_hidden <= _LANES          # toy-size packing limit
    qscale = jnp.concatenate([jnp.full((E,), 1.0 / math.sqrt(Dh), jnp.float32),
                              jnp.ones((2 * E,), jnp.float32)])
    qkv_off = add_mat(ap['in_proj_w'].T * qscale[None, :])                 # (E, 3E), q-scale folded
    wo_off = add_mat(ap['out_proj_w'].T)                                   # (E, E), rows = (head, d)
    ff_off = add_mat(hd['ff_w'].T)                                         # (E, NH); cols>=NH stay 0
    avrow = add_vec(ap['in_proj_b'] * qscale)
    add_vec(ap['out_proj_b'])
    add_vec(hd['g1']); add_vec(hd['b1'])
    add_vec(hd['ff_b']); add_vec(hd['g2']); add_vec(hd['b2'])

    wrows = _round_up(max(next_row[0], _WROW_ALIGN), _WROW_ALIGN)
    wslab = jnp.zeros((wrows, _LANES), jnp.float32)
    for off, m in zip(mat_offs, mats):
        wslab = wslab.at[off:off + m.shape[0], :m.shape[1]].set(m)
    wslab = wslab.astype(jnp.bfloat16)

    vrows = _round_up(max(len(vecs), 8), 8)
    vslab = jnp.zeros((vrows, _LANES), jnp.float32)
    for r, v in enumerate(vecs):
        vslab = vslab.at[r, :v.shape[0]].set(v.astype(jnp.float32))

    attn_meta = (E, n_heads, Dh, n_hidden, _LANES, lin,
                 qkv_off, wo_off, ff_off, avrow)
    meta = (in_len, C0, tuple(blocks_meta), attn_meta, (wrows, vrows))
    return wslab, vslab, meta


# --------------------------------------------------------------------------
# Pure-JAX reference (torch-layout math; same bf16-in / f32-acc matmul precision
# as the kernel so the smoke test isolates kernel plumbing)
# --------------------------------------------------------------------------
def _ref_forward(x_ncl, raw, kernels, strides, dilation, n_heads):
    bf = jnp.bfloat16
    h = x_ncl                                              # (B, C, L)
    for i, bp in enumerate(raw['blocks']):
        pad = get_same_pad(kernels[i], 1, dilation)
        y = jax.lax.conv_general_dilated(
            h.astype(bf), bp['conv_w'].astype(bf),
            window_strides=(1,), padding=[(pad, pad)], rhs_dilation=(dilation,),
            dimension_numbers=('NCH', 'OIH', 'NCH'),
            preferred_element_type=jnp.float32)
        y = y + bp['conv_b'][None, :, None]
        y = ((y - bp['bn_mean'][None, :, None])
             / jnp.sqrt(bp['bn_var'][None, :, None] + _BN_EPS)
             * bp['bn_gamma'][None, :, None] + bp['bn_beta'][None, :, None])
        y = jnp.maximum(y, 0.0)                            # ReLU; Dropout = identity (eval)
        scaled = jnp.einsum('bcl,oc->bol', h.astype(bf), bp['scale_w'][:, :, 0].astype(bf),
                            preferred_element_type=jnp.float32) + bp['scale_b'][None, :, None]
        h = y + scaled
        s = strides[i]
        if s > 1:                                          # AvgPool1d(s, padding=0)
            Bb, C, L = h.shape
            Lo = L // s
            hq = h.astype(bf).astype(jnp.float32)          # match kernel's bf16 pooling inputs
            h = hq[:, :, :Lo * s].reshape(Bb, C, Lo, s).mean(axis=-1)

    x = jnp.transpose(h, (0, 2, 1))                        # (B, T, E)
    ap = raw['attn']
    B, T, E = x.shape
    Dh = E // n_heads
    qkv = jnp.einsum('bte,fe->btf', x.astype(bf), ap['in_proj_w'].astype(bf),
                     preferred_element_type=jnp.float32) + ap['in_proj_b']
    q, k, v = qkv[..., :E], qkv[..., E:2 * E], qkv[..., 2 * E:]
    q = q * (1.0 / math.sqrt(Dh))
    q = q.reshape(B, T, n_heads, Dh)
    k = k.reshape(B, T, n_heads, Dh)
    v = v.reshape(B, T, n_heads, Dh)
    s = jnp.einsum('bqhd,bkhd->bhqk', q.astype(bf), k.astype(bf),
                   preferred_element_type=jnp.float32)
    p = jax.nn.softmax(s, axis=-1)
    o = jnp.einsum('bhqk,bkhd->bqhd', p.astype(bf), v.astype(bf),
                   preferred_element_type=jnp.float32).reshape(B, T, E)
    attn = jnp.einsum('bte,fe->btf', o.astype(bf), ap['out_proj_w'].astype(bf),
                      preferred_element_type=jnp.float32) + ap['out_proj_b']

    hd = raw['head']

    def ln(z, g, b):
        mu = jnp.mean(z, -1, keepdims=True)
        var = jnp.mean(jnp.square(z - mu), -1, keepdims=True)
        return (z - mu) / jnp.sqrt(var + _LN_EPS) * g + b

    z = ln(attn, hd['g1'], hd['b1'])
    y = jnp.einsum('bte,he->bth', z.astype(bf), hd['ff_w'].astype(bf),
                   preferred_element_type=jnp.float32) + hd['ff_b']
    return ln(y, hd['g2'], hd['b2'])


# --------------------------------------------------------------------------
if __name__ == "__main__":
    key = jax.random.PRNGKey(0)
    in_channel = 4
    out_channels = (8, 16)
    kernels = (3, 3)
    strides = (1, 2)
    dilation = 1
    dropout = 0.0            # eval mode: identity  # TODO(synk): train-mode dropout RNG not implemented
    n_attention_heads = 4
    n_hidden = 32
    B, L = 2, 16

    pkey, xkey = jax.random.split(key)
    raw_params = init_params(pkey, in_channel, out_channels, kernels,
                             n_attention_heads, n_hidden)
    wslab, vslab, meta = prepare_params(raw_params, kernels, strides, dilation,
                                        n_attention_heads, n_hidden, L)
    x = jax.random.normal(xkey, (B, in_channel, L), jnp.float32)   # NCL, like PyTorch

    out = stream_block_forward(x, wslab, vslab, meta=meta)
    out = jax.block_until_ready(out)

    ref = _ref_forward(x, raw_params, kernels, strides, dilation, n_attention_heads)
    assert out.shape == (B, L // strides[-1], n_hidden), out.shape
    max_err = float(jnp.max(jnp.abs(out - ref)))
    assert jnp.allclose(out, ref, rtol=2e-2, atol=2e-2), max_err
    print("KERNEL_OK")
</pallas_src>

<mosaic_0001>
module attributes {stable_mosaic.version = 11 : i64} {
  func.func @_stream_kernel(%arg0: i32, %arg1: memref<1x16x4xf32, #tpu.memory_space<vmem>>, %arg2: memref<144x128xbf16, #tpu.memory_space<vmem>>, %arg3: memref<16x128xf32, #tpu.memory_space<vmem>>, %arg4: memref<1x8x128xf32, #tpu.memory_space<vmem>>) attributes {dimension_semantics = [#tpu.dimension_semantics<parallel>], iteration_bounds = array<i64: 2>, scalar_prefetch = 0 : i64, scratch_operands = 0 : i64, tpu.core_type = #tpu.core_type<tc>, window_params = [{transform_indices = @transform_0, window_bounds = array<i64: 1, 16, 4>}, {pipeline_mode = #tpu.pipeline_mode<synchronous>, transform_indices = @transform_1, window_bounds = array<i64: 144, 128>}, {pipeline_mode = #tpu.pipeline_mode<synchronous>, transform_indices = @transform_2, window_bounds = array<i64: 16, 128>}, {transform_indices = @transform_3, window_bounds = array<i64: 1, 8, 128>}]} {
    %c0 = arith.constant 0 : index
    %c0_0 = arith.constant 0 : index
    %c0_1 = arith.constant 0 : index
    %0 = vector.load %arg1[%c0, %c0_0, %c0_1] : memref<1x16x4xf32, #tpu.memory_space<vmem>>, vector<1x16x4xf32>
    %1 = vector.shape_cast %0 : vector<1x16x4xf32> to vector<16x4xf32>
    %2 = arith.truncf %1 : vector<16x4xf32> to vector<16x4xbf16>
    %cst = arith.constant 0.000000e+00 : f32
    %3 = vector.broadcast %cst : f32 to vector<1x4xf32>
    %4 = tpu.concatenate %3, %1, %3 in 0 : vector<1x4xf32>, vector<16x4xf32>, vector<1x4xf32> -> vector<18x4xf32>
    %5 = arith.truncf %4 : vector<18x4xf32> to vector<18x4xbf16>
    %6 = vector.extract_strided_slice %5 {offsets = [0, 0], sizes = [16, 4], strides = [1, 1]} : vector<18x4xbf16> to vector<16x4xbf16>
    %c0_2 = arith.constant 0 : index
    %c0_3 = arith.constant 0 : index
    %7 = vector.load %arg2[%c0_2, %c0_3] : memref<144x128xbf16, #tpu.memory_space<vmem>>, vector<4x8xbf16>
    %cst_4 = arith.constant dense<0.000000e+00> : vector<16x8xf32>
    %8 = tpu.matmul %6, %7, %cst_4 {dimension_numbers = #tpu.dot_dimension_numbers<[1], [0], [0], [1], [0, 0, 1, 1], [], []>} : vector<16x4xbf16>, vector<4x8xbf16>, vector<16x8xf32> -> vector<16x8xf32>
    %9 = vector.extract_strided_slice %5 {offsets = [1, 0], sizes = [16, 4], strides = [1, 1]} : vector<18x4xbf16> to vector<16x4xbf16>
    %c4 = arith.constant 4 : index
    %c0_5 = arith.constant 0 : index
    %10 = vector.load %arg2[%c4, %c0_5] : memref<144x128xbf16, #tpu.memory_space<vmem>>, vector<4x8xbf16>
    %cst_6 = arith.constant dense<0.000000e+00> : vector<16x8xf32>
    %11 = tpu.matmul %9, %10, %cst_6 {dimension_numbers = #tpu.dot_dimension_numbers<[1], [0], [0], [1], [0, 0, 1, 1], [], []>} : vector<16x4xbf16>, vector<4x8xbf16>, vector<16x8xf32> -> vector<16x8xf32>
    %12 = arith.addf %8, %11 : vector<16x8xf32>
    %13 = vector.extract_strided_slice %5 {offsets = [2, 0], sizes = [16, 4], strides = [1, 1]} : vector<18x4xbf16> to vector<16x4xbf16>
    %c8 = arith.constant 8 : index
    %c0_7 = arith.constant 0 : index
    %14 = vector.load %arg2[%c8, %c0_7] : memref<144x128xbf16, #tpu.memory_space<vmem>>, vector<4x8xbf16>
    %cst_8 = arith.constant dense<0.000000e+00> : vector<16x8xf32>
    %15 = tpu.matmul %13, %14, %cst_8 {dimension_numbers = #tpu.dot_dimension_numbers<[1], [0], [0], [1], [0, 0, 1, 1], [], []>} : vector<16x4xbf16>, vector<4x8xbf16>, vector<16x8xf32> -> vector<16x8xf32>
    %16 = arith.addf %12, %15 : vector<16x8xf32>
    %c0_9 = arith.constant 0 : index
    %c0_10 = arith.constant 0 : index
    %17 = vector.load %arg3[%c0_9, %c0_10] : memref<16x128xf32, #tpu.memory_space<vmem>>, vector<1x8xf32>
    %18 = vector.broadcast %17 : vector<1x8xf32> to vector<16x8xf32>
    %19 = arith.mulf %16, %18 : vector<16x8xf32>
    %c1 = arith.constant 1 : index
    %c0_11 = arith.constant 0 : index
    %20 = vector.load %arg3[%c1, %c0_11] : memref<16x128xf32, #tpu.memory_space<vmem>>, vector<1x8xf32>
    %21 = vector.broadcast %20 : vector<1x8xf32> to vector<16x8xf32>
    %22 = arith.addf %19, %21 : vector<16x8xf32>
    %cst_12 = arith.constant 0.000000e+00 : f32
    %23 = vector.broadcast %cst_12 : f32 to vector<16x8xf32>
    %24 = arith.maximumf %22, %23 : vector<16x8xf32>
    %c16 = arith.constant 16 : index
    %c0_13 = arith.constant 0 : index
    %25 = vector.load %arg2[%c16, %c0_13] : memref<144x128xbf16, #tpu.memory_space<vmem>>, vector<4x8xbf16>
    %cst_14 = arith.constant dense<0.000000e+00> : vector<16x8xf32>
    %26 = tpu.matmul %2, %25, %cst_14 {dimension_numbers = #tpu.dot_dimension_numbers<[1], [0], [0], [1], [0, 0, 1, 1], [], []>} : vector<16x4xbf16>, vector<4x8xbf16>, vector<16x8xf32> -> vector<16x8xf32>
    %27 = arith.addf %24, %26 : vector<16x8xf32>
    %c2 = arith.constant 2 : index
    %c0_15 = arith.constant 0 : index
    %28 = vector.load %arg3[%c2, %c0_15] : memref<16x128xf32, #tpu.memory_space<vmem>>, vector<1x8xf32>
    %29 = vector.broadcast %28 : vector<1x8xf32> to vector<16x8xf32>
    %30 = arith.addf %27, %29 : vector<16x8xf32>
    %31 = arith.truncf %30 : vector<16x8xf32> to vector<16x8xbf16>
    %cst_16 = arith.constant 0.000000e+00 : f32
    %32 = vector.broadcast %cst_16 : f32 to vector<1x8xf32>
    %33 = tpu.concatenate %32, %30, %32 in 0 : vector<1x8xf32>, vector<16x8xf32>, vector<1x8xf32> -> vector<18x8xf32>
    %34 = arith.truncf %33 : vector<18x8xf32> to vector<18x8xbf16>
    %35 = vector.extract_strided_slice %34 {offsets = [0, 0], sizes = [16, 8], strides = [1, 1]} : vector<18x8xbf16> to vector<16x8xbf16>
    %c32 = arith.constant 32 : index
    %c0_17 = arith.constant 0 : index
    %36 = vector.load %arg2[%c32, %c0_17] : memref<144x128xbf16, #tpu.memory_space<vmem>>, vector<8x16xbf16>
    %cst_18 = arith.constant dense<0.000000e+00> : vector<16x16xf32>
    %37 = tpu.matmul %35, %36, %cst_18 {dimension_numbers = #tpu.dot_dimension_numbers<[1], [0], [0], [1], [0, 0, 1, 1], [], []>} : vector<16x8xbf16>, vector<8x16xbf16>, vector<16x16xf32> -> vector<16x16xf32>
    %38 = vector.extract_strided_slice %34 {offsets = [1, 0], sizes = [16, 8], strides = [1, 1]} : vector<18x8xbf16> to vector<16x8xbf16>
    %c40 = arith.constant 40 : index
    %c0_19 = arith.constant 0 : index
    %39 = vector.load %arg2[%c40, %c0_19] : memref<144x128xbf16, #tpu.memory_space<vmem>>, vector<8x16xbf16>
    %cst_20 = arith.constant dense<0.000000e+00> : vector<16x16xf32>
    %40 = tpu.matmul %38, %39, %cst_20 {dimension_numbers = #tpu.dot_dimension_numbers<[1], [0], [0], [1], [0, 0, 1, 1], [], []>} : vector<16x8xbf16>, vector<8x16xbf16>, vector<16x16xf32> -> vector<16x16xf32>
    %41 = arith.addf %37, %40 : vector<16x16xf32>
    %42 = vector.extract_strided_slice %34 {offsets = [2, 0], sizes = [16, 8], strides = [1, 1]} : vector<18x8xbf16> to vector<16x8xbf16>
    %c48 = arith.constant 48 : index
    %c0_21 = arith.constant 0 : index
    %43 = vector.load %arg2[%c48, %c0_21] : memref<144x128xbf16, #tpu.memory_space<vmem>>, vector<8x16xbf16>
    %cst_22 = arith.constant dense<0.000000e+00> : vector<16x16xf32>
    %44 = tpu.matmul %42, %43, %cst_22 {dimension_numbers = #tpu.dot_dimension_numbers<[1], [0], [0], [1], [0, 0, 1, 1], [], []>} : vector<16x8xbf16>, vector<8x16xbf16>, vector<16x16xf32> -> vector<16x16xf32>
    %45 = arith.addf %41, %44 : vector<16x16xf32>
    %c3 = arith.constant 3 : index
    %c0_23 = arith.constant 0 : index
    %46 = vector.load %arg3[%c3, %c0_23] : memref<16x128xf32, #tpu.memory_space<vmem>>, vector<1x16xf32>
    %47 = vector.broadcast %46 : vector<1x16xf32> to vector<16x16xf32>
    %48 = arith.mulf %45, %47 : vector<16x16xf32>
    %c4_24 = arith.constant 4 : index
    %c0_25 = arith.constant 0 : index
    %49 = vector.load %arg3[%c4_24, %c0_25] : memref<16x128xf32, #tpu.memory_space<vmem>>, vector<1x16xf32>
    %50 = vector.broadcast %49 : vector<1x16xf32> to vector<16x16xf32>
    %51 = arith.addf %48, %50 : vector<16x16xf32>
    %cst_26 = arith.constant 0.000000e+00 : f32
    %52 = vector.broadcast %cst_26 : f32 to vector<16x16xf32>
    %53 = arith.maximumf %51, %52 : vector<16x16xf32>
    %c64 = arith.constant 64 : index
    %c0_27 = arith.constant 0 : index
    %54 = vector.load %arg2[%c64, %c0_27] : memref<144x128xbf16, #tpu.memory_space<vmem>>, vector<8x16xbf16>
    %cst_28 = arith.constant dense<0.000000e+00> : vector<16x16xf32>
    %55 = tpu.matmul %31, %54, %cst_28 {dimension_numbers = #tpu.dot_dimension_numbers<[1], [0], [0], [1], [0, 0, 1, 1], [], []>} : vector<16x8xbf16>, vector<8x16xbf16>, vector<16x16xf32> -> vector<16x16xf32>
    %56 = arith.addf %53, %55 : vector<16x16xf32>
    %c5 = arith.constant 5 : index
    %c0_29 = arith.constant 0 : index
    %57 = vector.load %arg3[%c5, %c0_29] : memref<16x128xf32, #tpu.memory_space<vmem>>, vector<1x16xf32>
    %58 = vector.broadcast %57 : vector<1x16xf32> to vector<16x16xf32>
    %59 = arith.addf %56, %58 : vector<16x16xf32>
    %c80 = arith.constant 80 : index
    %c0_30 = arith.constant 0 : index
    %60 = vector.load %arg2[%c80, %c0_30] : memref<144x128xbf16, #tpu.memory_space<vmem>>, vector<8x16xbf16>
    %61 = arith.truncf %59 : vector<16x16xf32> to vector<16x16xbf16>
    %cst_31 = arith.constant dense<0.000000e+00> : vector<8x16xf32>
    %62 = tpu.matmul %60, %61, %cst_31 {dimension_numbers = #tpu.dot_dimension_numbers<[1], [0], [0], [1], [0, 0, 1, 1], [], []>} : vector<8x16xbf16>, vector<16x16xbf16>, vector<8x16xf32> -> vector<8x16xf32>
    %63 = arith.truncf %62 : vector<8x16xf32> to vector<8x16xbf16>
    %c96 = arith.constant 96 : index
    %c0_32 = arith.constant 0 : index
    %64 = vector.load %arg2[%c96, %c0_32] : memref<144x128xbf16, #tpu.memory_space<vmem>>, vector<16x48xbf16>
    %cst_33 = arith.constant dense<0.000000e+00> : vector<8x48xf32>
    %65 = tpu.matmul %63, %64, %cst_33 {dimension_numbers = #tpu.dot_dimension_numbers<[1], [0], [0], [1], [0, 0, 1, 1], [], []>} : vector<8x16xbf16>, vector<16x48xbf16>, vector<8x48xf32> -> vector<8x48xf32>
    %c6 = arith.constant 6 : index
    %c0_34 = arith.constant 0 : index
    %66 = vector.load %arg3[%c6, %c0_34] : memref<16x128xf32, #tpu.memory_space<vmem>>, vector<1x48xf32>
    %67 = vector.broadcast %66 : vector<1x48xf32> to vector<8x48xf32>
    %68 = arith.addf %65, %67 : vector<8x48xf32>
    %69 = arith.truncf %68 : vector<8x48xf32> to vector<8x48xbf16>
    %70 = vector.extract_strided_slice %69 {offsets = [0, 0], sizes = [8, 4], strides = [1, 1]} : vector<8x48xbf16> to vector<8x4xbf16>
    %71 = vector.extract_strided_slice %69 {offsets = [0, 16], sizes = [8, 4], strides = [1, 1]} : vector<8x48xbf16> to vector<8x4xbf16>
    %72 = vector.extract_strided_slice %69 {offsets = [0, 32], sizes = [8, 4], strides = [1, 1]} : vector<8x48xbf16> to vector<8x4xbf16>
    %cst_35 = arith.constant dense<0.000000e+00> : vector<8x8xf32>
    %73 = tpu.matmul %70, %71, %cst_35 {dimension_numbers = #tpu.dot_dimension_numbers<[1], [1], [0], [0], [0, 0, 1, 0], [], []>} : vector<8x4xbf16>, vector<8x4xbf16>, vector<8x8xf32> -> vector<8x8xf32>
    %cst_36 = arith.constant dense<0xFF800000> : vector<8xf32>
    %74 = vector.multi_reduction <maximumf>, %73, %cst_36 [1] : vector<8x8xf32> to vector<8xf32>
    %75 = vector.shape_cast %74 : vector<8xf32> to vector<8x1xf32>
    %76 = vector.broadcast %75 : vector<8x1xf32> to vector<8x8xf32>
    %77 = arith.subf %73, %76 : vector<8x8xf32>
    %78 = math.exp %77 : vector<8x8xf32>
    %cst_37 = arith.constant dense<0.000000e+00> : vector<8xf32>
    %79 = vector.multi_reduction <add>, %78, %cst_37 [1] : vector<8x8xf32> to vector<8xf32>
    %80 = vector.shape_cast %79 : vector<8xf32> to vector<8x1xf32>
    %81 = tpu.reciprocal %80 {approx = true} : vector<8x1xf32> -> vector<8x1xf32>
    %82 = vector.broadcast %81 : vector<8x1xf32> to vector<8x8xf32>
    %83 = arith.mulf %78, %82 : vector<8x8xf32>
    %84 = arith.truncf %83 : vector<8x8xf32> to vector<8x8xbf16>
    %cst_38 = arith.constant dense<0.000000e+00> : vector<8x4xf32>
    %85 = tpu.matmul %84, %72, %cst_38 {dimension_numbers = #tpu.dot_dimension_numbers<[1], [0], [0], [1], [0, 0, 1, 1], [], []>} : vector<8x8xbf16>, vector<8x4xbf16>, vector<8x4xf32> -> vector<8x4xf32>
    %86 = arith.truncf %85 : vector<8x4xf32> to vector<8x4xbf16>
    %c112 = arith.constant 112 : index
    %c0_39 = arith.constant 0 : index
    %87 = vector.load %arg2[%c112, %c0_39] : memref<144x128xbf16, #tpu.memory_space<vmem>>, vector<4x16xbf16>
    %cst_40 = arith.constant dense<0.000000e+00> : vector<8x16xf32>
    %88 = tpu.matmul %86, %87, %cst_40 {dimension_numbers = #tpu.dot_dimension_numbers<[1], [0], [0], [1], [0, 0, 1, 1], [], []>} : vector<8x4xbf16>, vector<4x16xbf16>, vector<8x16xf32> -> vector<8x16xf32>
    %89 = vector.extract_strided_slice %69 {offsets = [0, 4], sizes = [8, 4], strides = [1, 1]} : vector<8x48xbf16> to vector<8x4xbf16>
    %90 = vector.extract_strided_slice %69 {offsets = [0, 20], sizes = [8, 4], strides = [1, 1]} : vector<8x48xbf16> to vector<8x4xbf16>
    %91 = vector.extract_strided_slice %69 {offsets = [0, 36], sizes = [8, 4], strides = [1, 1]} : vector<8x48xbf16> to vector<8x4xbf16>
    %cst_41 = arith.constant dense<0.000000e+00> : vector<8x8xf32>
    %92 = tpu.matmul %89, %90, %cst_41 {dimension_numbers = #tpu.dot_dimension_numbers<[1], [1], [0], [0], [0, 0, 1, 0], [], []>} : vector<8x4xbf16>, vector<8x4xbf16>, vector<8x8xf32> -> vector<8x8xf32>
    %cst_42 = arith.constant dense<0xFF800000> : vector<8xf32>
    %93 = vector.multi_reduction <maximumf>, %92, %cst_42 [1] : vector<8x8xf32> to vector<8xf32>
    %94 = vector.shape_cast %93 : vector<8xf32> to vector<8x1xf32>
    %95 = vector.broadcast %94 : vector<8x1xf32> to vector<8x8xf32>
    %96 = arith.subf %92, %95 : vector<8x8xf32>
    %97 = math.exp %96 : vector<8x8xf32>
    %cst_43 = arith.constant dense<0.000000e+00> : vector<8xf32>
    %98 = vector.multi_reduction <add>, %97, %cst_43 [1] : vector<8x8xf32> to vector<8xf32>
    %99 = vector.shape_cast %98 : vector<8xf32> to vector<8x1xf32>
    %100 = tpu.reciprocal %99 {approx = true} : vector<8x1xf32> -> vector<8x1xf32>
    %101 = vector.broadcast %100 : vector<8x1xf32> to vector<8x8xf32>
    %102 = arith.mulf %97, %101 : vector<8x8xf32>
    %103 = arith.truncf %102 : vector<8x8xf32> to vector<8x8xbf16>
    %cst_44 = arith.constant dense<0.000000e+00> : vector<8x4xf32>
    %104 = tpu.matmul %103, %91, %cst_44 {dimension_numbers = #tpu.dot_dimension_numbers<[1], [0], [0], [1], [0, 0, 1, 1], [], []>} : vector<8x8xbf16>, vector<8x4xbf16>, vector<8x4xf32> -> vector<8x4xf32>
    %105 = arith.truncf %104 : vector<8x4xf32> to vector<8x4xbf16>
    %c116 = arith.constant 116 : index
    %c0_45 = arith.constant 0 : index
    %106 = vector.load %arg2[%c116, %c0_45] : memref<144x128xbf16, #tpu.memory_space<vmem>>, vector<4x16xbf16>
    %cst_46 = arith.constant dense<0.000000e+00> : vector<8x16xf32>
    %107 = tpu.matmul %105, %106, %cst_46 {dimension_numbers = #tpu.dot_dimension_numbers<[1], [0], [0], [1], [0, 0, 1, 1], [], []>} : vector<8x4xbf16>, vector<4x16xbf16>, vector<8x16xf32> -> vector<8x16xf32>
    %108 = arith.addf %88, %107 : vector<8x16xf32>
    %109 = vector.extract_strided_slice %69 {offsets = [0, 8], sizes = [8, 4], strides = [1, 1]} : vector<8x48xbf16> to vector<8x4xbf16>
    %110 = vector.extract_strided_slice %69 {offsets = [0, 24], sizes = [8, 4], strides = [1, 1]} : vector<8x48xbf16> to vector<8x4xbf16>
    %111 = vector.extract_strided_slice %69 {offsets = [0, 40], sizes = [8, 4], strides = [1, 1]} : vector<8x48xbf16> to vector<8x4xbf16>
    %cst_47 = arith.constant dense<0.000000e+00> : vector<8x8xf32>
    %112 = tpu.matmul %109, %110, %cst_47 {dimension_numbers = #tpu.dot_dimension_numbers<[1], [1], [0], [0], [0, 0, 1, 0], [], []>} : vector<8x4xbf16>, vector<8x4xbf16>, vector<8x8xf32> -> vector<8x8xf32>
    %cst_48 = arith.constant dense<0xFF800000> : vector<8xf32>
    %113 = vector.multi_reduction <maximumf>, %112, %cst_48 [1] : vector<8x8xf32> to vector<8xf32>
    %114 = vector.shape_cast %113 : vector<8xf32> to vector<8x1xf32>
    %115 = vector.broadcast %114 : vector<8x1xf32> to vector<8x8xf32>
    %116 = arith.subf %112, %115 : vector<8x8xf32>
    %117 = math.exp %116 : vector<8x8xf32>
    %cst_49 = arith.constant dense<0.000000e+00> : vector<8xf32>
    %118 = vector.multi_reduction <add>, %117, %cst_49 [1] : vector<8x8xf32> to vector<8xf32>
    %119 = vector.shape_cast %118 : vector<8xf32> to vector<8x1xf32>
    %120 = tpu.reciprocal %119 {approx = true} : vector<8x1xf32> -> vector<8x1xf32>
    %121 = vector.broadcast %120 : vector<8x1xf32> to vector<8x8xf32>
    %122 = arith.mulf %117, %121 : vector<8x8xf32>
    %123 = arith.truncf %122 : vector<8x8xf32> to vector<8x8xbf16>
    %cst_50 = arith.constant dense<0.000000e+00> : vector<8x4xf32>
    %124 = tpu.matmul %123, %111, %cst_50 {dimension_numbers = #tpu.dot_dimension_numbers<[1], [0], [0], [1], [0, 0, 1, 1], [], []>} : vector<8x8xbf16>, vector<8x4xbf16>, vector<8x4xf32> -> vector<8x4xf32>
    %125 = arith.truncf %124 : vector<8x4xf32> to vector<8x4xbf16>
    %c120 = arith.constant 120 : index
    %c0_51 = arith.constant 0 : index
    %126 = vector.load %arg2[%c120, %c0_51] : memref<144x128xbf16, #tpu.memory_space<vmem>>, vector<4x16xbf16>
    %cst_52 = arith.constant dense<0.000000e+00> : vector<8x16xf32>
    %127 = tpu.matmul %125, %126, %cst_52 {dimension_numbers = #tpu.dot_dimension_numbers<[1], [0], [0], [1], [0, 0, 1, 1], [], []>} : vector<8x4xbf16>, vector<4x16xbf16>, vector<8x16xf32> -> vector<8x16xf32>
    %128 = arith.addf %108, %127 : vector<8x16xf32>
    %129 = vector.extract_strided_slice %69 {offsets = [0, 12], sizes = [8, 4], strides = [1, 1]} : vector<8x48xbf16> to vector<8x4xbf16>
    %130 = vector.extract_strided_slice %69 {offsets = [0, 28], sizes = [8, 4], strides = [1, 1]} : vector<8x48xbf16> to vector<8x4xbf16>
    %131 = vector.extract_strided_slice %69 {offsets = [0, 44], sizes = [8, 4], strides = [1, 1]} : vector<8x48xbf16> to vector<8x4xbf16>
    %cst_53 = arith.constant dense<0.000000e+00> : vector<8x8xf32>
    %132 = tpu.matmul %129, %130, %cst_53 {dimension_numbers = #tpu.dot_dimension_numbers<[1], [1], [0], [0], [0, 0, 1, 0], [], []>} : vector<8x4xbf16>, vector<8x4xbf16>, vector<8x8xf32> -> vector<8x8xf32>
    %cst_54 = arith.constant dense<0xFF800000> : vector<8xf32>
    %133 = vector.multi_reduction <maximumf>, %132, %cst_54 [1] : vector<8x8xf32> to vector<8xf32>
    %134 = vector.shape_cast %133 : vector<8xf32> to vector<8x1xf32>
    %135 = vector.broadcast %134 : vector<8x1xf32> to vector<8x8xf32>
    %136 = arith.subf %132, %135 : vector<8x8xf32>
    %137 = math.exp %136 : vector<8x8xf32>
    %cst_55 = arith.constant dense<0.000000e+00> : vector<8xf32>
    %138 = vector.multi_reduction <add>, %137, %cst_55 [1] : vector<8x8xf32> to vector<8xf32>
    %139 = vector.shape_cast %138 : vector<8xf32> to vector<8x1xf32>
    %140 = tpu.reciprocal %139 {approx = true} : vector<8x1xf32> -> vector<8x1xf32>
    %141 = vector.broadcast %140 : vector<8x1xf32> to vector<8x8xf32>
    %142 = arith.mulf %137, %141 : vector<8x8xf32>
    %143 = arith.truncf %142 : vector<8x8xf32> to vector<8x8xbf16>
    %cst_56 = arith.constant dense<0.000000e+00> : vector<8x4xf32>
    %144 = tpu.matmul %143, %131, %cst_56 {dimension_numbers = #tpu.dot_dimension_numbers<[1], [0], [0], [1], [0, 0, 1, 1], [], []>} : vector<8x8xbf16>, vector<8x4xbf16>, vector<8x4xf32> -> vector<8x4xf32>
    %145 = arith.truncf %144 : vector<8x4xf32> to vector<8x4xbf16>
    %c124 = arith.constant 124 : index
    %c0_57 = arith.constant 0 : index
    %146 = vector.load %arg2[%c124, %c0_57] : memref<144x128xbf16, #tpu.memory_space<vmem>>, vector<4x16xbf16>
    %cst_58 = arith.constant dense<0.000000e+00> : vector<8x16xf32>
    %147 = tpu.matmul %145, %146, %cst_58 {dimension_numbers = #tpu.dot_dimension_numbers<[1], [0], [0], [1], [0, 0, 1, 1], [], []>} : vector<8x4xbf16>, vector<4x16xbf16>, vector<8x16xf32> -> vector<8x16xf32>
    %148 = arith.addf %128, %147 : vector<8x16xf32>
    %c7 = arith.constant 7 : index
    %c0_59 = arith.constant 0 : index
    %149 = vector.load %arg3[%c7, %c0_59] : memref<16x128xf32, #tpu.memory_space<vmem>>, vector<1x16xf32>
    %150 = vector.broadcast %149 : vector<1x16xf32> to vector<8x16xf32>
    %151 = arith.addf %148, %150 : vector<8x16xf32>
    %cst_60 = arith.constant dense<0.000000e+00> : vector<8xf32>
    %152 = vector.multi_reduction <add>, %151, %cst_60 [1] : vector<8x16xf32> to vector<8xf32>
    %153 = vector.shape_cast %152 : vector<8xf32> to vector<8x1xf32>
    %cst_61 = arith.constant 1.600000e+01 : f32
    %154 = vector.broadcast %cst_61 : f32 to vector<8x1xf32>
    %155 = arith.divf %153, %154 : vector<8x1xf32>
    %156 = vector.broadcast %155 : vector<8x1xf32> to vector<8x16xf32>
    %157 = arith.subf %151, %156 : vector<8x16xf32>
    %158 = arith.mulf %157, %157 : vector<8x16xf32>
    %cst_62 = arith.constant dense<0.000000e+00> : vector<8xf32>
    %159 = vector.multi_reduction <add>, %158, %cst_62 [1] : vector<8x16xf32> to vector<8xf32>
    %160 = vector.shape_cast %159 : vector<8xf32> to vector<8x1xf32>
    %cst_63 = arith.constant 1.600000e+01 : f32
    %161 = vector.broadcast %cst_63 : f32 to vector<8x1xf32>
    %162 = arith.divf %160, %161 : vector<8x1xf32>
    %163 = vector.broadcast %155 : vector<8x1xf32> to vector<8x16xf32>
    %164 = arith.subf %151, %163 : vector<8x16xf32>
    %cst_64 = arith.constant 9.99999974E-6 : f32
    %165 = vector.broadcast %cst_64 : f32 to vector<8x1xf32>
    %166 = arith.addf %162, %165 : vector<8x1xf32>
    %167 = math.rsqrt %166 : vector<8x1xf32>
    %168 = vector.broadcast %167 : vector<8x1xf32> to vector<8x16xf32>
    %169 = arith.mulf %164, %168 : vector<8x16xf32>
    %c8_65 = arith.constant 8 : index
    %c0_66 = arith.constant 0 : index
    %170 = vector.load %arg3[%c8_65, %c0_66] : memref<16x128xf32, #tpu.memory_space<vmem>>, vector<1x16xf32>
    %171 = vector.broadcast %170 : vector<1x16xf32> to vector<8x16xf32>
    %172 = arith.mulf %169, %171 : vector<8x16xf32>
    %c9 = arith.constant 9 : index
    %c0_67 = arith.constant 0 : index
    %173 = vector.load %arg3[%c9, %c0_67] : memref<16x128xf32, #tpu.memory_space<vmem>>, vector<1x16xf32>
    %174 = vector.broadcast %173 : vector<1x16xf32> to vector<8x16xf32>
    %175 = arith.addf %172, %174 : vector<8x16xf32>
    %176 = arith.truncf %175 : vector<8x16xf32> to vector<8x16xbf16>
    %c128 = arith.constant 128 : index
    %c0_68 = arith.constant 0 : index
    %177 = vector.load %arg2[%c128, %c0_68] : memref<144x128xbf16, #tpu.memory_space<vmem>>, vector<16x128xbf16>
    %cst_69 = arith.constant dense<0.000000e+00> : vector<8x128xf32>
    %178 = tpu.matmul %176, %177, %cst_69 {dimension_numbers = #tpu.dot_dimension_numbers<[1], [0], [0], [1], [0, 0, 1, 1], [], []>} : vector<8x16xbf16>, vector<16x128xbf16>, vector<8x128xf32> -> vector<8x128xf32>
    %c10 = arith.constant 10 : index
    %c0_70 = arith.constant 0 : index
    %179 = vector.load %arg3[%c10, %c0_70] : memref<16x128xf32, #tpu.memory_space<vmem>>, vector<1x128xf32>
    %180 = vector.broadcast %179 : vector<1x128xf32> to vector<8x128xf32>
    %181 = arith.addf %178, %180 : vector<8x128xf32>
    %182 = tpu.iota {dimensions = array<i32: 1>} : vector<1x128xi32>
    %c32_i32 = arith.constant 32 : i32
    %183 = vector.broadcast %c32_i32 : i32 to vector<1x128xi32>
    %184 = arith.cmpi slt, %182, %183 : vector<1x128xi32>
    %185 = arith.extui %184 : vector<1x128xi1> to vector<1x128xi32>
    %186 = arith.sitofp %185 : vector<1x128xi32> to vector<1x128xf32>
    %cst_71 = arith.constant dense<0.000000e+00> : vector<8xf32>
    %187 = vector.multi_reduction <add>, %181, %cst_71 [1] : vector<8x128xf32> to vector<8xf32>
    %188 = vector.shape_cast %187 : vector<8xf32> to vector<8x1xf32>
    %cst_72 = arith.constant 3.125000e-02 : f32
    %189 = vector.broadcast %cst_72 : f32 to vector<8x1xf32>
    %190 = arith.mulf %188, %189 : vector<8x1xf32>
    %191 = vector.broadcast %190 : vector<8x1xf32> to vector<8x128xf32>
    %192 = arith.subf %181, %191 : vector<8x128xf32>
    %193 = vector.broadcast %186 : vector<1x128xf32> to vector<8x128xf32>
    %194 = arith.mulf %192, %193 : vector<8x128xf32>
    %195 = arith.mulf %194, %194 : vector<8x128xf32>
    %cst_73 = arith.constant dense<0.000000e+00> : vector<8xf32>
    %196 = vector.multi_reduction <add>, %195, %cst_73 [1] : vector<8x128xf32> to vector<8xf32>
    %197 = vector.shape_cast %196 : vector<8xf32> to vector<8x1xf32>
    %cst_74 = arith.constant 3.125000e-02 : f32
    %198 = vector.broadcast %cst_74 : f32 to vector<8x1xf32>
    %199 = arith.mulf %197, %198 : vector<8x1xf32>
    %cst_75 = arith.constant 9.99999974E-6 : f32
    %200 = vector.broadcast %cst_75 : f32 to vector<8x1xf32>
    %201 = arith.addf %199, %200 : vector<8x1xf32>
    %202 = math.rsqrt %201 : vector<8x1xf32>
    %203 = vector.broadcast %202 : vector<8x1xf32> to vector<8x128xf32>
    %204 = arith.mulf %194, %203 : vector<8x128xf32>
    %c11 = arith.constant 11 : index
    %c0_76 = arith.constant 0 : index
    %205 = vector.load %arg3[%c11, %c0_76] : memref<16x128xf32, #tpu.memory_space<vmem>>, vector<1x128xf32>
    %206 = vector.broadcast %205 : vector<1x128xf32> to vector<8x128xf32>
    %207 = arith.mulf %204, %206 : vector<8x128xf32>
    %c12 = arith.constant 12 : index
    %c0_77 = arith.constant 0 : index
    %208 = vector.load %arg3[%c12, %c0_77] : memref<16x128xf32, #tpu.memory_space<vmem>>, vector<1x128xf32>
    %209 = vector.broadcast %208 : vector<1x128xf32> to vector<8x128xf32>
    %210 = arith.addf %207, %209 : vector<8x128xf32>
    %211 = vector.shape_cast %210 : vector<8x128xf32> to vector<1x8x128xf32>
    %c0_78 = arith.constant 0 : index
    %c0_79 = arith.constant 0 : index
    %c0_80 = arith.constant 0 : index
    %212 = vector.load %arg4[%c0_78, %c0_79, %c0_80] : memref<1x8x128xf32, #tpu.memory_space<vmem>>, vector<1x8x128xf32>
    tpu.vector_store %arg4[%c0_78, %c0_79, %c0_80], %211 {strides = array<i32>} : memref<1x8x128xf32, #tpu.memory_space<vmem>>, vector<1x8x128xf32>,
    return
  }
  func.func @transform_0(%arg0: i32) -> (i32, i32, i32) {
    %c0_i32 = arith.constant 0 : i32
    %c0_i32_0 = arith.constant 0 : i32
    %c0_i32_1 = arith.constant 0 : i32
    return %arg0, %c0_i32, %c0_i32_0 : i32, i32, i32
  }
  func.func @transform_1(%arg0: i32) -> (i32, i32) {
    %c0_i32 = arith.constant 0 : i32
    %c0_i32_0 = arith.constant 0 : i32
    %c0_i32_1 = arith.constant 0 : i32
    return %c0_i32, %c0_i32_0 : i32, i32
  }
  func.func @transform_2(%arg0: i32) -> (i32, i32) {
    %c0_i32 = arith.constant 0 : i32
    %c0_i32_0 = arith.constant 0 : i32
    %c0_i32_1 = arith.constant 0 : i32
    return %c0_i32, %c0_i32_0 : i32, i32
  }
  func.func @transform_3(%arg0: i32) -> (i32, i32, i32) {
    %c0_i32 = arith.constant 0 : i32
    %c0_i32_0 = arith.constant 0 : i32
    %c0_i32_1 = arith.constant 0 : i32
    return %arg0, %c0_i32, %c0_i32_0 : i32, i32, i32
  }
}

</mosaic_0001>

<bundles_post_ra>
// kernel: stream_block_forward.1
= control target key start
LH: loop header
LB: loop body
LE: loop exit
PB: predicated region body
PF: predicated region fallthrough
CT: control target
= control target key end

     0   :  { %8 = vsyncpa [#allocation3], 0  ;;  %s1526_s0 = inlined_call_operand.vmem [shape: f32[2,16,4], index: 0, kind: input, shape index: {}]   ;;  %s1527_s1 = inlined_call_operand.hbm [shape: bf16[144,128], index: 1, kind: input, shape index: {}]   ;;  %s1528_s2 = inlined_call_operand.vmem [shape: f32[16,128], index: 2, kind: input, shape index: {}]   ;;  %s1529_s3 = inlined_call_operand.hbm [shape: f32[2,8,128], index: 3, kind: output, shape index: {}]  }
   0x1   :  { %9 = vsyncpa [#allocation4], 0 }
   0x2   :  { %11 = vsyncpa [#allocation4 + $0x1], 0  ;;  %s1309_s12 = smov 0   ;;  %s1311_s13 = smov 0  }
   0x3   :  { %s1313_s14 = smov 0   ;;  %s1315_s15 = smov 0  }
   0x4 LB: > { %s1330_s16 = sadd.s32 4294967295, %s1271_s15   ;;  %s1027_s17 = sadd.s32 4294967294, %s1271_s15   ;;  %s1271_s15 = sphi %s1315_s15, %s1535_s15   ;;  %s1267_s14 = sphi %s1313_s14, %s1534_s14   ;;  %s1263_s13 = sphi %s1311_s13, %s1533_s13   ;;  %s1259_s12 = sphi %s1309_s12, %s1532_s12  }
   0x5   : > { %s1334_s18 = sadd.s32 1, %s1271_s15   ;;  %s92_s19 = sadd.s32 1, %s1267_s14 }
   0x6   : > { %s89_s20 = ssub.s32 %s1271_s15, %s1334_s18  ;;  %p102_p0 = scmp.ne.s32.totalorder %s1267_s14, %s1263_s13 }
   0x7   : > { %p90_p1 = scmp.eq.s32.totalorder %s89_s20, 0  ;;  %p103_p2 = scmp.eq.s32.totalorder %s1330_s16, 1 }
   0x8   : > { %p108_p3 = scmp.ne.s32.totalorder %s1263_s13, %s1259_s12  ;;  %p109_p4 = scmp.eq.s32.totalorder %s1027_s17, 1 }
   0x9   : > { %s1345_s21 = scalar_select %p90_p1, %s1267_s14, %s92_s19  }
   0xa   : > { %p1347_p5 = por %p103_p2, %p102_p0  ;;  %p1351_p6 = por %p109_p4, %p108_p3 }
   0xb   : > { %p1028_p7 = scmp.ge.s32.totalorder %s1271_s15, 1  ;;  %p116_p8 = scmp.lt.s32.totalorder %s1271_s15, 3 }
   0xc   : > { %p1089_p9 = scmp.eq.s32.totalorder %s1330_s16, 0  ;;  %s127_s26 = sshll.u32 %s1527_s1, 4  ;;  %s128_s26 = int_to_ptr.hbm [resolvable:$true] %s127_s26 }
   0xd   : > { %p117_p10 = pnand %p1028_p7, %p116_p8  ;;  %s1273_s27 = smov [#allocation2]  }
   0xe   : > { %s129_s28 = sshll.u32 %s1273_s27, 4  ;;  %s1274_s29 = smov 64   ;;  %s130_s28 = int_to_ptr.vmem [resolvable:$true] %s129_s28 }
   0xf   : > { %p1081_p11 = pneg %p117_p10  ;;  %s1275_s30 = smov 4  }
  0x10   : > { %156 = sbr.rel (%p117_p10) target bundleno = 2623 (0xa3f), region = 32 }
  0x11   : > { %p1082_p12 = pnand %p1089_p9, %p1081_p11 }
  0x13   : > { %1084 = dma.hbm_to_vmem [thread:$0]  (!%p1082_p12), %s128_s26, 1152, %s130_s28, [#allocation3], %s1274_s29, %s1274_s29, %s1275_s30  }
  0x15   : > { %1250 = dma.done.wait (%p1089_p9), [#allocation3], 1152  }
  0x16   : > { %1252 = vsyncadd (%p1089_p9), [#allocation3], 4294966144  ;;  %p181_p13 = scmp.lt.s32.totalorder %s1330_s16, 1  ;;  %vm235_vm0 = vcmask 1041408   ;;  %v204_v0 = vld [vmem:[#allocation2] sm:$0x3] }
  0x17   : > { %vm192_vm1 = vcmask 1040384   ;;  %v256_v3 = vsel %vm235_vm0, %v204_v0, 0  ;;  %v272_v6 = vld [vmem:[#allocation2 + $0x4] sm:$0x3]  ;;  %vm231_vm2 = vcmask 31744   ;;  %vm273_vm3 = vcmask 1046528  }
  0x18   : > { %s182_s4 = scalar_select %p181_p13, %s1330_s16, 1  ;;  %265 = vmatpush.bf16.msra.mxu1 %v256_v3  ;;  %v281_v7 = vsel %vm235_vm0, %v272_v6, 0  ;;  %v309_v8 = vld [vmem:[#allocation2 + $0x8] sm:$0x3]  ;;  %v205_v10 = vld [vmem:[#allocation2] sm:$0xc] }
  0x19   : > { %290 = vmatpush.bf16.msra.mxu2 %v281_v7  ;;  %v314_v13 = vsel %vm235_vm0, %v309_v8, 0  ;;  %v228_v18 = vunpack.c.l.b16 %v205_v10  ;;  %vm214_vm4 = vsmask.f32 7424  ;;  %vm376_vm5 = vcmask 1043456   ;;  %v449_v37 = vld [vmem:[#allocation2 + $0x20] sm:$0xf] }
  0x1a   : > { %s1072_s5 = sshll.u32 %s182_s4, 4  ;;  %323 = vmatpush.bf16.msra.mxu3 %v314_v13  ;;  %v454_v38 = vsel %vm376_vm5, %v449_v37, 0  ;;  %v350_v39 = vld [vmem:[#allocation2 + $0x10] sm:$0xf]  ;;  %v413_v42 = vld [vmem:[#allocation2 + $0x18] sm:$0xf] }
  0x1b   : > { %s185_s8 = scalar_lea.vmem %s1526_s0, %s1072_s5  ;;  %v229_v22 = vpack.c.b16 %v228_v18, %v228_v18  ;;  %v397_v40 = vsel %vm376_vm5, %v350_v39, 0  ;;  %v421_v43 = vsel %vm376_vm5, %v413_v42, 0  ;;  %v1140_v47 = vld [vmem:[%s1528_s2] ss:$0 sm:$0xff]  ;;  %v351_v48 = vld [vmem:[#allocation2 + $0x14] sm:$0xf] }
  0x1c   : > { %v187_v1 = vld [vmem:[%s185_s8] sm:$0xff]  ;;  %v188_v2 = vld [vmem:[%s185_s8 + $0x8] sm:$0xff]  ;;  %406 = vmatpush.bf16.msrb.mxu1 %v397_v40  ;;  %v378_v51 = vsel %vm376_vm5, %v351_v48, 0  ;;  %vm372_vm6 = vcmask 64512   ;;  %vm478_vm7 = vcmask 130048   ;;  %s1276_s5 = smov 108  }
  0x1d   : > { %v193_v4 = vrot.slane %v187_v1, 7  ;;  %v194_v5 = vrot.slane %v188_v2, 7  ;;  %v189_v9 = vpack.c.bf16 %v188_v2, %v187_v1  ;;  %v230_v25 = vrot.slane %v229_v22, 2  ;;  %430 = vmatpush.bf16.msrb.mxu2 %v421_v43  ;;  %v1141_v50 = vld [vmem:[%s1528_s2 + $0x1] ss:$0 sm:$0xff]  ;;  %s1277_s6 = smov 112  }
  0x1e   : > { %463 = vmatpush.bf16.msrb.mxu3 %v454_v38  ;;  %v1142_v58 = vld [vmem:[%s1528_s2 + $0x2] ss:$0 sm:$0xff]  ;;  %v1144_v37 = vld [vmem:[%s1528_s2 + $0x4] ss:$0 sm:$0xff]  ;;  %s1278_s7 = smov 124   ;;  %s1279_s8 = smov 104  }
  0x1f   : > { %v195_v11 = vsel %vm192_vm1, %v193_v4, %v194_v5  ;;  %v199_v12 = vsel %vm192_vm1, 0.0, %v193_v4  ;;  %v200_v14 = vsel %vm192_vm1, %v194_v5, 0.0  ;;  %1039 = vmatmul.msk.bf16.vlgmr.msra.gmra.mxu3 %vm231_vm2, %v189_v9  ;;  %v237_v28 = vsel %vm235_vm0, %v230_v25, 0  ;;  %s1280_s9 = smov 100   ;;  %s1281_s10 = smov 120  }
  0x20   : > { %v201_v15 = vpack.c.bf16 %v199_v12, %v199_v12  ;;  %v202_v16 = vpack.c.bf16 %v195_v11, %v195_v11  ;;  %v203_v17 = vpack.c.bf16 %v200_v14, %v200_v14  ;;  %246 = vmatpush.bf16.msra.mxu0 %v237_v28  ;;  %s1282_s11 = smov 96   ;;  %s1283_s17 = smov 116  }
  0x21   : > { %s1284_s19 = smov 88   ;;  %s1285_s20 = smov 84  }
  0x22   : > { %v209_v19 = vunpack.c.l.b16 %v201_v15  ;;  %v210_v20 = vunpack.c.l.b16 %v202_v16  ;;  %v211_v21 = vunpack.c.l.b16 %v203_v17  ;;  %s1286_s24 = smov 92  }
  0x24   : > { %v212_v23 = vpack.c.b16 %v210_v20, %v209_v19  ;;  %v213_v24 = vpack.c.b16 %v211_v21, %v211_v21  ;;  %387 = vmatpush.bf16.msrb.mxu0 %v378_v51 }
  0x26   : > { %1037 = vmatmul.msk.bf16.vlgmr.msra.gmra.mxu1 %vm231_vm2, %v212_v23  ;;  %v274_v26 = vrot.slane %v212_v23, 1  ;;  %v275_v27 = vrot.slane %v213_v24, 1  ;;  %v216_v29 = vshrl.u32 %v212_v23, 16  ;;  %v218_v30 = vshll.u32 %v212_v23, 16 }
  0x27   : > { %v223_v31 = vshll.u32 %v213_v24, 16 }
  0x28   : > { %v276_v32 = vsel %vm273_vm3, %v274_v26, %v275_v27  ;;  %v220_v33 = vrot.slane %v218_v30, 1 }
  0x29   : > { %1038 = vmatmul.msk.bf16.vlgmr.msra.gmra.mxu2 %vm231_vm2, %v276_v32  ;;  %v225_v34 = vrot.slane %v223_v31, 1 }
  0x2a   : > { %v221_v35 = vor.u32 %v220_v33, %v216_v29  ;;  %v1143_v33 = vld [vmem:[%s1528_s2 + $0x3] ss:$0 sm:$0xff] }
  0x2c   : > { %v226_v36 = vsel %vm214_vm4, %v221_v35, %v225_v34 }
  0x2d   : > { %1036 = vmatmul.msk.bf16.vlgmr.msra.gmra.mxu0 %vm231_vm2, %v226_v36 }
  0xa2   : > { %v325_v54 = vpop.f32.mrf.mxu3 }
  0xa3   : > { %v267_v41 = vpop.f32.mrf.mxu1 }
  0xaa   : > { %v248_v44 = vpop.f32.mrf.mxu0  ;;  %v327_v4 = vpop.f32.mrf.mxu3 }
  0xab   : > { %v268_v45 = vadd.f32 %v267_v41, %v248_v44  ;;  %v269_v55 = vpop.f32.mrf.mxu1 }
  0xac   : > { %v292_v46 = vpop.f32.mrf.mxu2 }
  0xad   : > { %v297_v49 = vadd.f32 %v292_v46, %v268_v45 }
  0xaf   : > { %v301_v52 = vmul.f32 %v1140_v47, %v297_v49  ;;  %v1145_v49 = vld [vmem:[%s1528_s2 + $0x5] ss:$0 sm:$0xff] }
  0xb1   : > { %v305_v53 = vadd.f32 %v1141_v50, %v301_v52 }
  0xb2   : > { %v250_v56 = vpop.f32.mrf.mxu0 }
  0xb3   : > { %v307_v57 = vmax.f32 %v305_v53, 0.0  ;;  %v270_v59 = vadd.f32 %v269_v55, %v250_v56  ;;  %v476_v56 = vld [vmem:[#allocation2 + $0x28] sm:$0xf] }
  0xb4   : > { %v294_v60 = vpop.f32.mrf.mxu2 }
  0xb5   : > { %v330_v61 = vadd.f32 %v325_v54, %v307_v57  ;;  %v298_v62 = vadd.f32 %v294_v60, %v270_v59  ;;  %v1073_v57 = vld [vmem:[#allocation2 + $0x30] sm:$0xff] }
  0xb6   : > { %516 = vmatpush.bf16.msra.mxu1 %v1073_v57 }
  0xb7   : > { %v334_v63 = vadd.f32 %v1142_v58, %v330_v61  ;;  %v302_v0 = vmul.f32 %v1140_v47, %v298_v62  ;;  %v1146_v61 = vld [vmem:[%s1528_s2 + $0x6] ss:$0 sm:$0xff] }
  0xb9   : > { %v306_v1 = vadd.f32 %v1141_v50, %v302_v0  ;;  %v339_v2 = vrot.slane %v334_v63, 7 }
  0xbb   : > { %v308_v3 = vmax.f32 %v306_v1, 0.0  ;;  %v345_v6 = vsel %vm192_vm1, 0.0, %v339_v2 }
  0xbc   : > { %v347_v10 = vpack.c.bf16 %v345_v6, %v345_v6 }
  0xbd   : > { %v331_v5 = vadd.f32 %v327_v4, %v308_v3 }
  0xbe   : > { %v355_v15 = vunpack.c.l.b16 %v347_v10 }
  0xbf   : > { %v335_v7 = vadd.f32 %v1142_v58, %v331_v5 }
  0xc1   : > { %v336_v8 = vpack.c.bf16 %v335_v7, %v334_v63  ;;  %v340_v9 = vrot.slane %v335_v7, 7 }
  0xc3   : > { %v341_v11 = vsel %vm192_vm1, %v339_v2, %v340_v9  ;;  %v346_v12 = vsel %vm192_vm1, %v340_v9, 0.0  ;;  %1043 = vmatmul.msk.bf16.vlgmr.msrb.gmra.mxu3 %vm372_vm6, %v336_v8 }
  0xc4   : > { %v348_v13 = vpack.c.bf16 %v341_v11, %v341_v11  ;;  %v349_v14 = vpack.c.bf16 %v346_v12, %v346_v12 }
  0xc6   : > { %v357_v16 = vunpack.c.l.b16 %v349_v14  ;;  %v356_v17 = vunpack.c.l.b16 %v348_v13 }
  0xc8   : > { %v359_v18 = vpack.c.b16 %v357_v16, %v357_v16  ;;  %v358_v19 = vpack.c.b16 %v356_v17, %v355_v15 }
  0xca   : > { %1041 = vmatmul.msk.bf16.vlgmr.msrb.gmra.mxu1 %vm372_vm6, %v358_v19  ;;  %v414_v20 = vrot.slane %v358_v19, 1  ;;  %v415_v21 = vrot.slane %v359_v18, 1  ;;  %v363_v22 = vshll.u32 %v358_v19, 16  ;;  %v368_v23 = vshll.u32 %v359_v18, 16 }
  0xcb   : > { %v361_v25 = vshrl.u32 %v358_v19, 16 }
  0xcc   : > { %v416_v24 = vsel %vm273_vm3, %v414_v20, %v415_v21  ;;  %v365_v26 = vrot.slane %v363_v22, 1  ;;  %v370_v28 = vrot.slane %v368_v23, 1 }
  0xcd   : > { %1042 = vmatmul.msk.bf16.vlgmr.msrb.gmra.mxu2 %vm372_vm6, %v416_v24 }
  0xce   : > { %v366_v27 = vor.u32 %v365_v26, %v361_v25 }
  0xd0   : > { %v371_v29 = vsel %vm214_vm4, %v366_v27, %v370_v28 }
  0xd1   : > { %1040 = vmatmul.msk.bf16.vlgmr.msrb.gmra.mxu0 %vm372_vm6, %v371_v29 }
 0x146   : > { %v465_v38 = vpop.f32.mrf.mxu3 }
 0x147   : > { %v408_v30 = vpop.f32.mrf.mxu1 }
 0x14e   : > { %v389_v31 = vpop.f32.mrf.mxu0  ;;  %v467_v51 = vpop.f32.mrf.mxu3 }
 0x14f   : > { %v409_v32 = vadd.f32 %v408_v30, %v389_v31  ;;  %v410_v39 = vpop.f32.mrf.mxu1 }
 0x150   : > { %v432_v34 = vpop.f32.mrf.mxu2 }
 0x151   : > { %v437_v35 = vadd.f32 %v432_v34, %v409_v32  ;;  %v581_v34 = vld [vmem:[#allocation2 + $0x38] sm:$0x3] }
 0x153   : > { %v441_v36 = vmul.f32 %v1143_v33, %v437_v35 }
 0x155   : > { %v445_v41 = vadd.f32 %v1144_v37, %v441_v36 }
 0x156   : > { %v391_v40 = vpop.f32.mrf.mxu0 }
 0x157   : > { %v411_v42 = vadd.f32 %v410_v39, %v391_v40  ;;  %v447_v45 = vmax.f32 %v445_v41, 0.0 }
 0x158   : > { %v434_v43 = vpop.f32.mrf.mxu2 }
 0x159   : > { %v438_v44 = vadd.f32 %v434_v43, %v411_v42  ;;  %v470_v48 = vadd.f32 %v465_v38, %v447_v45 }
 0x15b   : > { %v442_v46 = vmul.f32 %v1143_v33, %v438_v44  ;;  %v474_v53 = vadd.f32 %v1145_v49, %v470_v48 }
 0x15d   : > { %v446_v47 = vadd.f32 %v1144_v37, %v442_v46  ;;  %v667_v37 = vsel %vm235_vm0, %v581_v34, 0 }
 0x15f   : > { %v448_v50 = vmax.f32 %v446_v47, 0.0 }
 0x161   : > { %v471_v52 = vadd.f32 %v467_v51, %v448_v50 }
 0x163   : > { %v475_v54 = vadd.f32 %v1145_v49, %v471_v52 }
 0x165   : > { %v477_v55 = vpack.c.bf16 %v475_v54, %v474_v53 }
 0x167   : > { %489 = vmatpush.bf16.msra.mxu0 %v477_v55 }
 0x16a   : > { %1044 = vmatmul.msk.bf16.vlgmr.msra.gmra.mxu0 %vm478_vm7, %v476_v56 }
 0x1e7   : > { %v491_v58 = vpop.f32.mrf.mxu0 }
 0x1e8   : > { %v495_v59 = vpack.c.bf16 %v491_v58, %v491_v58 }
 0x1ea   : > { %1049 = vmatmul.msk.bf16.vlgmr.msra.gmra.mxu1 %vm478_vm7, %v495_v59 }
 0x1ef   : > { %v493_v60 = vpop.f32.mrf.mxu0 }
 0x267   : > { %v518_v62 = vpop.f32.mrf.mxu1 }
 0x268   : > { %v519_v63 = vadd.f32 %v1146_v61, %v518_v62 }
 0x26a   : > { %v522_v0 = vpack.c.bf16 %v519_v63, %v519_v63 }
 0x26c   : > { %v524_v1 = vunpack.c.l.b16 %v522_v0 }
 0x26e   : > { %v1421_v2 = vpack.c.b16 %v524_v1, %v524_v1 }
 0x26f   : > { %v520_v3 = vpop.f32.mrf.mxu1 }
 0x270   : > { %584 = vrot.lane.b32.xlu2 %v1421_v2, %s1276_s5  ;;  %526 = vrot.lane.b32.xlu0 %v1421_v2, %s1277_s6  ;;  %s178_s6 = sand.u32 1, %s1263_s13   ;;  %s1225_s5 = scalar_lea.hbm %s1529_s3, 16 }
 0x271   : > { %s941_s27 = scalar_lea.sflag [#allocation4], %s178_s6 }
 0x278   : > { %582 = vrot.lane.b32.xlu2 %v1421_v2, %s1278_s7  ;;  %s1033_s7 = sshll.u32 %s178_s6, 3 }
 0x279   : > { %s180_s25 = scalar_lea.vmem [#allocation5], %s1033_s7 }
 0x280   : > { %684 = vrot.lane.b32.xlu2 %v1421_v2, %s1279_s8  ;;  %s1069_s8 = sshll.u32 %s1330_s16, 3  ;;  %s953_s16 = sshll.u32 %s180_s25, 4  ;;  %s954_s16 = int_to_ptr.vmem [resolvable:$true] %s953_s16 }
 0x288   : > { %762 = vrot.lane.b32.xlu2 %v1421_v2, %s1280_s9 }
 0x290   : > { %682 = vrot.lane.b32.xlu2 %v1421_v2, %s1281_s10 }
 0x2ca   : > { %v585_v4 = vpop.permute.xlu2 %584 }
 0x2cb   : > { %v590_v5 = vsel %vm231_vm2, %v585_v4, 0 }
 0x2cc   : > { %599 = vmatpush.bf16.xpose.msrb.mxu0 %v590_v5 }
 0x2d2   : > { %v583_v6 = vpop.permute.xlu2 %582 }
 0x2d3   : > { %1052 = vmatmul.msk.bf16.vlgmr.msrb.gmra.mxu0 %vm231_vm2, %v583_v6 }
 0x2da   : > { %v685_v7 = vpop.permute.xlu2 %684 }
 0x2db   : > { %v690_v8 = vsel %vm231_vm2, %v685_v7, 0 }
 0x2dc   : > { %699 = vmatpush.bf16.xpose.msra.mxu0 %v690_v8 }
 0x2e2   : > { %v763_v9 = vpop.permute.xlu2 %762  ;;  %v527_v10 = vpop.permute.xlu0 %526 }
 0x2e3   : > { %v532_v11 = vsel %vm231_vm2, %v527_v10, 0  ;;  %v768_v40 = vsel %vm231_vm2, %v763_v9, 0  ;;  %v639_v10 = vld [vmem:[#allocation2 + $0x38] sm:$0xc] }
 0x2e4   : > { %541 = vmatpush.bf16.xpose.msra.mxu2 %v532_v11  ;;  %v641_v11 = vunpack.c.l.b16 %v639_v10 }
 0x2ea   : > { %v683_v12 = vpop.permute.xlu2 %682 }
 0x2eb   : > { %1050 = vmatmul.msk.bf16.vlgmr.msra.gmra.mxu2 %vm231_vm2, %v522_v0  ;;  %1056 = vmatmul.msk.bf16.vlgmr.msra.gmra.mxu0 %vm231_vm2, %v683_v12  ;;  %v642_v12 = vpack.c.b16 %v641_v11, %v641_v11 }
 0x350   : > { %v601_v13 = vpop.f32.mrf.mxu0 }
 0x351   : > { %v605_v14 = vsel %vm372_vm6, %v601_v13, -inf }
 0x352   : > { %606 = vmax.xlane.f32.xlu2 %v605_v14 }
 0x358   : > { %v603_v15 = vpop.f32.mrf.mxu0 }
 0x368   : > { %v701_v16 = vpop.f32.mrf.mxu0 }
 0x369   : > { %v705_v31 = vsel %vm372_vm6, %v701_v16, -inf }
 0x36e   : > { %v543_v17 = vpop.f32.mrf.mxu2 }
 0x36f   : > { %v547_v18 = vsel %vm372_vm6, %v543_v17, -inf }
 0x370   : > { %548 = vmax.xlane.f32.xlu0 %v547_v18  ;;  %v703_v19 = vpop.f32.mrf.mxu0 }
 0x376   : > { %v545_v20 = vpop.f32.mrf.mxu2 }
 0x3c5   : > { %v607_v21 = vpop.xlane.xlu2 %606 }
 0x3c6   : > { %v608_v22 = vsub.f32 %v601_v13, %v607_v21  ;;  %v643_v13 = vrot.slane %v642_v12, 2  ;;  %v1150_v12 = vld [vmem:[%s1528_s2 + $0xa] ss:$0 sm:$0xff] }
 0x3c8   : > { %v609_v23 = vmul.f32 1.442695, %v608_v22  ;;  %v648_v14 = vsel %vm235_vm0, %v643_v13, 0 }
 0x3c9   : > { %657 = vmatpush.bf16.msrb.mxu2 %v648_v14 }
 0x3ca   : > { %1153 = vpow2.f32 %v609_v23 }
 0x3d0   : > { %v1437_v24 = vpop.eup %1153 }
 0x3d1   : > { %v611_v25 = vsel %vm372_vm6, %v1437_v24, 0.0 }
 0x3d2   : > { %612 = vadd.xlane.f32.xlu0 %v611_v25 }
 0x3e3   : > { %v549_v26 = vpop.xlane.xlu0 %548 }
 0x3e4   : > { %v550_v27 = vsub.f32 %v543_v17, %v549_v26 }
 0x3e6   : > { %v551_v28 = vmul.f32 1.442695, %v550_v27  ;;  %v817_v27 = vld [vmem:[#allocation2 + $0x3c] sm:$0xc] }
 0x3e8   : > { %1155 = vpow2.f32 %v551_v28  ;;  %v819_v28 = vunpack.c.l.b16 %v817_v27 }
 0x3ee   : > { %v1156_v29 = vpop.eup %1155 }
 0x3ef   : > { %v553_v30 = vsel %vm372_vm6, %v1156_v29, 0.0 }
 0x3f0   : > { %554 = vadd.xlane.f32.xlu1 %v553_v30 }
 0x409   : > { %559 = vrot.lane.b32.xlu1 %v1421_v2, %s1282_s11 }
 0x411   : > { %760 = vrot.lane.b32.xlu1 %v1421_v2, %s1283_s17 }
 0x43b   : > { %706 = vmax.xlane.f32.xlu1 %v705_v31 }
 0x445   : > { %v613_v58 = vpop.xlane.xlu0 %612 }
 0x454   : > { %717 = vrot.lane.b32.xlu1 %v1421_v2, %s1284_s19  ;;  %s951_s19 = scalar_lea.hbm %s1529_s3, %s1069_s8 }
 0x455   : > { %s955_s26 = sshll.u32 %s951_s19, 4  ;;  %s956_s26 = int_to_ptr.hbm [resolvable:$true] %s955_s26 }
 0x456   : > { %s1219_s28 = sshra.s32 %s956_s26, 4  ;;  %s1220_s28 = int_to_ptr.hbm [resolvable:$true] %s1219_s28 }
 0x457   : > { %s1221_s29 = scalar_lea.hbm %s1220_s28, 8  ;;  %p1226_p3 = scmp.lt.s32.totalorder %s1220_s28, %s1529_s3 }
 0x458   : > { %p1222_p0 = scmp.ne.s32.totalorder %s1220_s28, %s1221_s29  ;;  %p1227_p4 = scmp.lt.s32.totalorder %s1225_s5, %s1221_s29 }
 0x45a   : > { %p1223_p1 = pnand %p1222_p0, %p1347_p5  ;;  %p1228_p7 = por %p1227_p4, %p1226_p3 }
 0x45c   : > { %p1224_p2 = pneg %p1223_p1 }
 0x45e   : > { %p1229_p8 = pnand %p1228_p7, %p1224_p2 }
 0x463   : > { %v555_v32 = vpop.xlane.xlu1 %554 }
 0x464   : > { %1157 = vrcp.f32 %v555_v32 }
 0x46a   : > { %v1158_v33 = vpop.eup %1157 }
 0x46b   : > { %v557_v35 = vmul.f32 %v1158_v33, %v1156_v29  ;;  %v820_v29 = vpack.c.b16 %v819_v28, %v819_v28 }
 0x46d   : > { %v558_v39 = vpack.c.bf16 %v557_v35, %v557_v35  ;;  %v821_v30 = vrot.slane %v820_v29, 2 }
 0x46f   : > { %v826_v31 = vsel %vm235_vm0, %v821_v30, 0 }
 0x47b   : > { %v560_v36 = vpop.permute.xlu1 %559 }
 0x47c   : > { %v565_v38 = vsel %vm376_vm5, %v560_v36, 0 }
 0x47d   : > { %574 = vmatpush.bf16.msra.mxu3 %v565_v38 }
 0x480   : > { %1051 = vmatmul.msk.bf16.vlgmr.msra.gmra.mxu3 %vm372_vm6, %v558_v39 }
 0x481   : > { %676 = vmatpush.bf16.msrb.mxu3 %v667_v37 }
 0x483   : > { %v761_v41 = vpop.permute.xlu1 %760 }
 0x485   : > { %777 = vmatpush.bf16.xpose.msra.mxu3 %v768_v40 }
 0x4ae   : > { %v707_v42 = vpop.xlane.xlu1 %706 }
 0x4af   : > { %v708_v43 = vsub.f32 %v701_v16, %v707_v42  ;;  %v739_v16 = vld [vmem:[#allocation2 + $0x3c] sm:$0x3] }
 0x4b0   : > { %v744_v17 = vsel %vm235_vm0, %v739_v16, 0  ;;  %v907_v16 = vlaneseq }
 0x4b1   : > { %v709_v44 = vmul.f32 1.442695, %v708_v43  ;;  %753 = vmatpush.bf16.msra.mxu2 %v744_v17 }
 0x4b2   : > { %v908_v17 = vand.u32 127, %v907_v16 }
 0x4b3   : > { %1159 = vpow2.f32 %v709_v44 }
 0x4b4   : > { %vm909_vm12 = vcmp.lt.s32.totalorder %v908_v17, 32 }
 0x4b9   : > { %v1160_v45 = vpop.eup %1159 }
 0x4ba   : > { %v711_v46 = vsel %vm372_vm6, %v1160_v45, 0.0 }
 0x4bb   : > { %712 = vadd.xlane.f32.xlu2 %v711_v46 }
 0x4c6   : > { %v718_v3 = vpop.permute.xlu1 %717 }
 0x4c7   : > { %v723_v6 = vsel %vm376_vm5, %v718_v3, 0 }
 0x4d3   : > { %795 = vrot.lane.b32.xlu2 %v1421_v2, %s1285_s20 }
 0x503   : > { %v576_v47 = vpop.f32.mrf.mxu3 }
 0x504   : > { %v580_v48 = vpack.c.bf16 %v576_v47, %v576_v47  ;;  %v1287_v47 = vmov 16.0  }
 0x506   : > { %1055 = vmatmul.msk.bf16.vlgmr.msrb.gmra.mxu3 %vm231_vm2, %v580_v48 }
 0x50b   : > { %v578_v49 = vpop.f32.mrf.mxu3 }
 0x516   : > { %1059 = vmatmul.msk.bf16.vlgmr.msra.gmra.mxu3 %vm231_vm2, %v761_v41  ;;  %v1147_v41 = vld [vmem:[%s1528_s2 + $0x7] ss:$0 sm:$0xff] }
 0x52e   : > { %v713_v50 = vpop.xlane.xlu2 %712 }
 0x536   : > { %v796_v51 = vpop.permute.xlu2 %795 }
 0x537   : > { %v801_v52 = vsel %vm376_vm5, %v796_v51, 0 }
 0x538   : > { %810 = vmatpush.bf16.msrb.mxu0 %v801_v52 }
 0x589   : > { %v1455_v53 = vpop.f32.mrf.mxu3 }
 0x591   : > { %v680_v54 = vpop.f32.mrf.mxu3 }
 0x599   : > { %v779_v55 = vpop.f32.mrf.mxu3 }
 0x59a   : > { %v783_v56 = vsel %vm372_vm6, %v779_v55, -inf }
 0x59b   : > { %784 = vmax.xlane.f32.xlu0 %v783_v56 }
 0x5a1   : > { %v781_v57 = vpop.f32.mrf.mxu3 }
 0x5af   : > { %617 = vrot.lane.b32.xlu0 %v1421_v2, %s1286_s24 }
 0x60e   : > { %v785_v59 = vpop.xlane.xlu0 %784 }
 0x60f   : > { %v786_v60 = vsub.f32 %v779_v55, %v785_v59  ;;  %v1074_v59 = vld [vmem:[#allocation2 + $0x40] sm:$0xff] }
 0x611   : > { %v787_v61 = vmul.f32 1.442695, %v786_v60 }
 0x613   : > { %1161 = vpow2.f32 %v787_v61 }
 0x614   : > { %1163 = vrcp.f32 %v613_v58 }
 0x615   : > { %1165 = vrcp.f32 %v713_v50 }
 0x619   : > { %v1162_v62 = vpop.eup %1161 }
 0x61a   : > { %v789_v63 = vsel %vm372_vm6, %v1162_v62, 0.0  ;;  %v1164_v0 = vpop.eup %1163 }
 0x61b   : > { %790 = vadd.xlane.f32.xlu0 %v789_v63  ;;  %v615_v1 = vmul.f32 %v1164_v0, %v1437_v24  ;;  %v1166_v7 = vpop.eup %1165 }
 0x61c   : > { %v715_v8 = vmul.f32 %v1166_v7, %v1160_v45 }
 0x61d   : > { %v616_v2 = vpack.c.bf16 %v615_v1, %v615_v1 }
 0x61e   : > { %v716_v9 = vpack.c.bf16 %v715_v8, %v715_v8  ;;  %v1149_v8 = vld [vmem:[%s1528_s2 + $0x9] ss:$0 sm:$0xff] }
 0x621   : > { %v618_v4 = vpop.permute.xlu0 %617 }
 0x622   : > { %v623_v5 = vsel %vm376_vm5, %v618_v4, 0 }
 0x623   : > { %632 = vmatpush.bf16.msrb.mxu1 %v623_v5 }
 0x626   : > { %1053 = vmatmul.msk.bf16.vlgmr.msrb.gmra.mxu1 %vm372_vm6, %v616_v2 }
 0x627   : > { %732 = vmatpush.bf16.msra.mxu1 %v723_v6  ;;  %v1148_v6 = vld [vmem:[%s1528_s2 + $0x8] ss:$0 sm:$0xff] }
 0x62b   : > { %835 = vmatpush.bf16.msrb.mxu1 %v826_v31 }
 0x636   : > { %1057 = vmatmul.msk.bf16.vlgmr.msra.gmra.mxu1 %vm372_vm6, %v716_v9 }
 0x68e   : > { %v791_v15 = vpop.xlane.xlu0 %790 }
 0x68f   : > { %1167 = vrcp.f32 %v791_v15 }
 0x690   : > { %1169 = vrcp.f32 %v1287_v47 }
 0x695   : > { %v1168_v18 = vpop.eup %1167 }
 0x696   : > { %v793_v19 = vmul.f32 %v1168_v18, %v1162_v62  ;;  %v1170_v48 = vpop.eup %1169 }
 0x697   : > { %v849_v49 = vmul.f32 16.0, %v1170_v48  ;;  %vm853_vm8 = vweird.f32 %v1170_v48 }
 0x698   : > { %v794_v20 = vpack.c.bf16 %v793_v19, %v793_v19 }
 0x699   : > { %v850_v50 = vsub.f32 1.0, %v849_v49 }
 0x69a   : > { %1060 = vmatmul.msk.bf16.vlgmr.msrb.gmra.mxu0 %vm372_vm6, %v794_v20  ;;  %v1288_v20 = vmov 0.0  }
 0x69b   : > { %v851_v51 = vmul.f32 %v1170_v48, %v850_v50 }
 0x69d   : > { %v852_v52 = vadd.f32 %v1170_v48, %v851_v51 }
 0x6a3   : > { %v634_v21 = vpop.f32.mrf.mxu1 }
 0x6a4   : > { %v638_v22 = vpack.c.bf16 %v634_v21, %v634_v21  ;;  %v1067_v21 = vsel %vm909_vm12, 1.0, %v1288_v20 }
 0x6a6   : > { %1054 = vmatmul.msk.bf16.vlgmr.msrb.gmra.mxu2 %vm231_vm2, %v638_v22 }
 0x6a7   : > { %901 = vmatpush.bf16.msrb.mxu2 %v1074_v59 }
 0x6ab   : > { %v636_v23 = vpop.f32.mrf.mxu1 }
 0x6b3   : > { %v734_v24 = vpop.f32.mrf.mxu1 }
 0x6b4   : > { %v738_v25 = vpack.c.bf16 %v734_v24, %v734_v24 }
 0x6b6   : > { %1058 = vmatmul.msk.bf16.vlgmr.msra.gmra.mxu2 %vm231_vm2, %v738_v25 }
 0x6bb   : > { %v736_v26 = vpop.f32.mrf.mxu1 }
 0x717   : > { %v812_v32 = vpop.f32.mrf.mxu0 }
 0x718   : > { %v816_v33 = vpack.c.bf16 %v812_v32, %v812_v32 }
 0x71a   : > { %1061 = vmatmul.msk.bf16.vlgmr.msrb.gmra.mxu1 %vm231_vm2, %v816_v33 }
 0x71f   : > { %v814_v34 = vpop.f32.mrf.mxu0 }
 0x720   : > { %v1151_v34 = vld [vmem:[%s1528_s2 + $0xb] ss:$0 sm:$0xff] }
 0x729   : > { %v659_v35 = vpop.f32.mrf.mxu2 }
 0x72a   : > { %v679_v37 = vadd.f32 %v1455_v53, %v659_v35  ;;  %v854_v53 = vsel %vm853_vm8, %v1170_v48, %v852_v52 }
 0x731   : > { %v661_v36 = vpop.f32.mrf.mxu2 }
 0x739   : > { %v755_v38 = vpop.f32.mrf.mxu2 }
 0x73a   : > { %v759_v39 = vadd.f32 %v755_v38, %v679_v37  ;;  %v1152_v37 = vld [vmem:[%s1528_s2 + $0xc] ss:$0 sm:$0xff] }
 0x741   : > { %v757_v40 = vpop.f32.mrf.mxu2 }
 0x797   : > { %v837_v42 = vpop.f32.mrf.mxu1 }
 0x798   : > { %v841_v43 = vadd.f32 %v837_v42, %v759_v39 }
 0x79a   : > { %v844_v44 = vadd.f32 %v1147_v41, %v841_v43 }
 0x79c   : > { %v845_v45 = vsel %vm478_vm7, %v844_v44, 0.0 }
 0x79d   : > { %846 = vadd.xlane.f32.xlu1 %v845_v45 }
 0x79f   : > { %v839_v46 = vpop.f32.mrf.mxu1 }
 0x810   : > { %v847_v54 = vpop.xlane.xlu1 %846 }
 0x811   : > { %v855_v55 = vmul.f32 %v854_v53, %v847_v54 }
 0x813   : > { %v856_v56 = vsub.f32 %v844_v44, %v855_v55 }
 0x815   : > { %v857_v57 = vmul.f32 %v856_v56, %v856_v56 }
 0x817   : > { %v858_v58 = vsel %vm478_vm7, %v857_v57, 0.0 }
 0x818   : > { %859 = vadd.xlane.f32.xlu2 %v858_v58 }
 0x88b   : > { %v860_v60 = vpop.xlane.xlu2 %859 }
 0x88c   : > { %v861_v61 = vmul.f32 %v860_v60, %v854_v53 }
 0x88e   : > { %v862_v62 = vadd.f32 1e-05, %v861_v61 }
 0x890   : > { %1171 = vrsqrt.f32 %v862_v62  ;;  %vm869_vm10 = vweird.f32 %v862_v62 }
 0x896   : > { %v1172_v63 = vpop.eup %1171 }
 0x897   : > { %v864_v0 = vmul.f32 %v1172_v63, %v862_v62  ;;  %vm870_vm9 = vweird.f32 %v1172_v63 }
 0x898   : > { %vm871_vm11 = vmor %vm869_vm10, %vm870_vm9 }
 0x899   : > { %v865_v1 = vmul.f32 %v1172_v63, %v864_v0 }
 0x89b   : > { %v866_v3 = vmul.f32 0.5, %v865_v1 }
 0x89d   : > { %v867_v4 = vsub.f32 1.5, %v866_v3 }
 0x89f   : > { %v868_v5 = vmul.f32 %v1172_v63, %v867_v4 }
 0x8a1   : > { %v872_v2 = vsel %vm871_vm11, %v1172_v63, %v868_v5 }
 0x8a2   : > { %v873_v7 = vmul.f32 %v872_v2, %v856_v56 }
 0x8a4   : > { %v876_v9 = vmul.f32 %v1148_v6, %v873_v7 }
 0x8a6   : > { %v879_v10 = vadd.f32 %v1149_v8, %v876_v9 }
 0x8a8   : > { %v880_v11 = vpack.c.bf16 %v879_v10, %v879_v10 }
 0x8aa   : > { %1066 = vmatmul.msk.bf16.vlgmr.msrb.gmra.mxu2 %vm478_vm7, %v880_v11 }
 0x92d   : > { %v903_v13 = vpop.f32.mrf.mxu2 }
 0x92e   : > { %v904_v14 = vadd.f32 %v1150_v12, %v903_v13 }
 0x930   : > { %912 = vadd.xlane.f32.xlu0 %v904_v14 }
 0x935   : > { %v905_v15 = vpop.f32.mrf.mxu2 }
 0x9a3   : > { %v913_v18 = vpop.xlane.xlu0 %912 }
 0x9a4   : > { %v914_v19 = vmul.f32 0.03125, %v913_v18 }
 0x9a6   : > { %v915_v22 = vsub.f32 %v904_v14, %v914_v19 }
 0x9a8   : > { %v916_v23 = vmul.f32 %v1067_v21, %v915_v22 }
 0x9aa   : > { %v917_v24 = vmul.f32 %v916_v23, %v916_v23 }
 0x9ac   : > { %918 = vadd.xlane.f32.xlu0 %v917_v24 }
 0xa1f   : > { %v919_v25 = vpop.xlane.xlu0 %918 }
 0xa20   : > { %v920_v26 = vmul.f32 0.03125, %v919_v25 }
 0xa22   : > { %v921_v27 = vadd.f32 1e-05, %v920_v26 }
 0xa24   : > { %1173 = vrsqrt.f32 %v921_v27  ;;  %vm928_vm14 = vweird.f32 %v921_v27 }
 0xa2a   : > { %v1174_v28 = vpop.eup %1173 }
 0xa2b   : > { %v923_v29 = vmul.f32 %v1174_v28, %v921_v27  ;;  %vm929_vm13 = vweird.f32 %v1174_v28 }
 0xa2c   : > { %vm930_vm15 = vmor %vm928_vm14, %vm929_vm13 }
 0xa2d   : > { %v924_v30 = vmul.f32 %v1174_v28, %v923_v29 }
 0xa2f   : > { %v925_v31 = vmul.f32 0.5, %v924_v30 }
 0xa31   : > { %v926_v32 = vsub.f32 1.5, %v925_v31 }
 0xa33   : > { %v927_v33 = vmul.f32 %v1174_v28, %v926_v32 }
 0xa35   : > { %v931_v35 = vsel %vm930_vm15, %v1174_v28, %v927_v33 }
 0xa36   : > { %v932_v36 = vmul.f32 %v931_v35, %v916_v23 }
 0xa38   : > { %v935_v38 = vmul.f32 %v1151_v34, %v932_v36 }
 0xa3a   : > { %v938_v39 = vadd.f32 %v1152_v37, %v935_v38 }
 0xa3c   : > { %939 = vst [vmem:[%s180_s25] sm:$0xff] %v938_v39 }
 0xa3d   : > { %1232 = shalt.err (!%p1229_p8)
}
 0xa3e   : > { %1079 = dma.vmem_to_hbm [thread:$0]  (%p1347_p5), %s954_s16, 128, %s956_s26, %s941_s27  }
 0xa3f PF: > { %p1091_p9 = scmp.ge.s32.totalorder %s1271_s15, 2  ;;  %s967_s6 = sand.u32 1, %s1259_s12  }
 0xa40   : > { %s968_s9 = scalar_lea.sflag [#allocation4], %s967_s6 }
 0xa41   : > { %p1086_p10 = pnand %p1091_p9, %p1351_p6 }
 0xa43   : > { %p1087_p11 = pneg %p1086_p10 }
 0xa45   : > { %1254 = dma.done.wait (%p1087_p11), %s968_s9, 128  }
 0xa46   : > { %1256 = vsyncadd (%p1087_p11), %s968_s9, 4294967168  ;;  %p14_p12 = scmp.ge.s32.totalorder %s1334_s18, 4   ;;  %s1532_s12 = smov %s1263_s13 }
 0xa47   : > { %s1533_s13 = smov %s1267_s14  ;;  %s1534_s14 = smov %s1345_s21 }
 0xa48   : > { %s1535_s15 = smov %s1334_s18  ;;  %16 = sbr.rel (!%p14_p12) target bundleno = 4 (0x4), region = 72 }
 0xa4d   :  { %974 = vsyncpa [#allocation3], 1 }
 0xa4e   :  { %976 = vsyncpa [#allocation3 + $0x1], 1 }
 0xa4f   :  { %977 = vsyncpa [#allocation4], 1 }
 0xa50   :  { %979 = vsyncpa [#allocation4 + $0x1], 1 }

</bundles_post_ra>
